<compile_context>
chip_gen: v7x
topology: tpu7x:2x2x1
jax: 0.10.0
libtpu: 0.0.40
codegen_flags: <defaults>
</compile_context>

<pallas_src>
import functools

import jax
import jax.numpy as jnp
from jax import lax
from jax.experimental import pallas as pl
from jax.experimental.pallas import tpu as pltpu

EPS = 1e-5
LANE = 128
SUB = 16          # bf16 sublane packing -> keep L tiles a multiple of 16


def _round_up(n, m):
    return ((n + m - 1) // m) * m


def _fold_bn(gamma, beta, mean, var):
    scale = gamma / jnp.sqrt(var + EPS)
    shift = beta - mean * scale
    return scale, shift


def _pad_last(a, target):
    pad = target - a.shape[-1]
    if pad == 0:
        return a
    return jnp.pad(a, [(0, 0)] * (a.ndim - 1) + [(0, pad)])


def _derived_vmem_limit(block_l, cin_p, w_p, cout_p):
    """VMEM limit from the actual block sizes, capped at half physical VMEM."""
    # Double-buffered activation tiles (bf16) + halo.
    io = 2 * block_l * (cin_p + cout_p) * 2 + 2 * 2 * cin_p * 2
    # Weights (bf16) + folded-BN vectors (f32), default double-buffered.
    wts = (2 * (cin_p * w_p + 3 * w_p * w_p + w_p * cout_p) * 2
           + 2 * (4 * w_p + 2 * cout_p) * 4)
    # In-kernel temporaries (h/h_prev/h_next f32, h_cat bf16, h2/h3/out f32, x f32).
    tmp = block_l * (3 * w_p * 4 + 3 * w_p * 2 + w_p * 4 + 2 * cout_p * 4
                     + cin_p * 4)
    est = 2 * (io + wts + tmp)                      # 2x headroom for Mosaic scratch
    est = max(est, 16 * 1024 * 1024)
    try:                                            # v7x: only 64 MiB per TC
        cap = pltpu.get_tpu_info().vmem_capacity_bytes
    except Exception:
        cap = 64 * 1024 * 1024
    return int(min(est, max(cap // 2, 16 * 1024 * 1024)))


def bottleneck_kernel(x_ref, halo_ref, w1_ref, w2_ref, w3_ref,
                      s1_ref, b1_ref, s2_ref, b2_ref, s3_ref, b3_ref,
                      o_ref, *, seq_len, block_l):
    """One (batch, L-tile) grid step.  Shapes (channel-padded):
         x_ref:    (1, block_l, Cin_p)  bf16
         halo_ref: (1, 1, 2, Cin_p)     bf16   rows = [left nbr, right nbr]
         w1_ref:   (Cin_p, W_p)    bf16
         w2_ref:   (3*W_p, W_p)    bf16   (conv2 taps stacked along K)
         w3_ref:   (W_p, Cout_p)   bf16
         s*/b*:    (1, C_p)        f32    folded BN scale / shift
         o_ref:    (1, block_l, Cout_p) bf16
    """
    tile = pl.program_id(1)
    row0 = tile * block_l                          # global row of local row 0

    x = x_ref[0]                                   # (tL, Cin_p) bf16
    halo = halo_ref[0, 0]                          # (2, Cin_p)  bf16

    w1 = w1_ref[...]
    s1 = s1_ref[...]
    b1 = b1_ref[...]

    def conv1_bn1_relu(v):                         # (n, Cin_p) bf16 -> (n, W_p) f32
        h = jnp.dot(v, w1, preferred_element_type=jnp.float32)
        return jnp.maximum(h * s1 + b1, 0.0)

    # conv1 (1x1) + bn1 + relu on the tile and on the two halo rows.
    h = conv1_bn1_relu(x)                          # (tL, W_p) f32
    h_halo = conv1_bn1_relu(halo)                  # (2, W_p)  f32

    # Rows past the true sequence end must behave like conv2's zero padding.
    # With the ragged last L block those rows were read out of bounds (garbage),
    # so use a select (NaN-safe), not a multiply.  For interior tiles this is an
    # all-true select: pure VPU filler under the HBM-bound regime.
    local = lax.broadcasted_iota(jnp.int32, (block_l, 1), 0)
    row_ok = (row0 + local) < seq_len              # (tL, 1) bool
    h = jnp.where(row_ok, h, 0.0)

    # Halo rows only count if their global index lies inside [0, seq_len).
    left_ok = tile > 0
    right_ok = (row0 + block_l) < seq_len
    h_left = jnp.where(left_ok, h_halo[0:1], 0.0)      # (1, W_p)
    h_right = jnp.where(right_ok, h_halo[1:2], 0.0)    # (1, W_p)

    # conv2 (k=3, pad=1, stride=1): neighbour rows via XLU rolls (the wrapped
    # row is patched with the halo row / zeros), then ONE fused K=3*W_p matmul.
    is_first = local == 0
    is_last = local == (block_l - 1)
    h_prev = jnp.where(is_first, h_left, pltpu.roll(h, shift=1, axis=0))
    h_next = jnp.where(is_last, h_right,
                       pltpu.roll(h, shift=block_l - 1, axis=0))   # roll by -1
    h_cat = jnp.concatenate([h_prev, h, h_next], axis=-1).astype(jnp.bfloat16)

    h2 = jnp.dot(h_cat, w2_ref[...], preferred_element_type=jnp.float32)
    h2 = jnp.maximum(h2 * s2_ref[...] + b2_ref[...], 0.0)

    # conv3 (1x1) + bn3.
    h3 = jnp.dot(h2.astype(jnp.bfloat16), w3_ref[...],
                 preferred_element_type=jnp.float32)
    h3 = h3 * s3_ref[...] + b3_ref[...]

    # Residual add (downsample is None -> identity) + relu in f32; bf16 store
    # (lane-dense vst, half the HBM writeback).
    out = jnp.maximum(h3 + x.astype(jnp.float32), 0.0)
    o_ref[0] = out.astype(o_ref.dtype)


def bottleneck_forward_nlc(x_nlc, conv1_w, conv2_w, conv3_w, bn1, bn2, bn3,
                           *, block_l=None):
    """Channels-last forward.  x_nlc: (B, L, Cin) float. Returns (B, L, Cout) bf16.

    conv*_w are PyTorch-layout Conv1d weights (out, in, k); bn* are
    (gamma, beta, running_mean, running_var) tuples (eval-mode BatchNorm1d).
    """
    B, L, Cin = x_nlc.shape
    width = conv1_w.shape[0]
    Cout = conv3_w.shape[0]
    assert conv2_w.shape == (width, width, 3), conv2_w.shape
    # Identity residual requires inplanes == planes * expansion.
    assert Cin == Cout, "identity residual needs inplanes == planes * expansion"
    # TODO(synk): stride>1 and the downsample branch are not implemented; the
    # module defaults (stride=1, downsample=None) are what is modeled.

    cin_p = _round_up(Cin, LANE)
    w_p = _round_up(width, LANE)
    cout_p = _round_up(Cout, LANE)
    # NOTE: if Cin/width << 128 (tiny test configs), the lane padding wastes
    # most MXU FLOPs / HBM bytes; real ResNet stages are lane multiples.

    if block_l is None:
        # Cap the tile to bound VMEM / live ranges; shrink for very wide stages
        # (v7x: 64 MiB VMEM per TensorCore).
        block_l = 256 if max(cin_p, cout_p) >= 2048 else 512
        block_l = min(block_l, _round_up(L, SUB))
    block_l = max(SUB, _round_up(block_l, SUB))
    n_lt = -(-L // block_l)                        # ragged last tile allowed

    f32 = jnp.float32
    bf16 = jnp.bfloat16

    # Weights -> channels-last matmul form, lane-padded, bf16.  conv2's three
    # taps are stacked along the contraction axis for a single K=3*W_p matmul.
    w1_p = jnp.pad(conv1_w[:, :, 0].T,
                   ((0, cin_p - Cin), (0, w_p - width))).astype(bf16)     # (Cin_p, W_p)
    w2_t = jnp.pad(jnp.transpose(conv2_w, (2, 1, 0)),                     # (k, in, out)
                   ((0, 0), (0, w_p - width), (0, w_p - width)))
    w2_cat = w2_t.reshape(3 * w_p, w_p).astype(bf16)                      # (3*W_p, W_p)
    w3_p = jnp.pad(conv3_w[:, :, 0].T,
                   ((0, w_p - width), (0, cout_p - Cout))).astype(bf16)   # (W_p, Cout_p)

    # Folded BN, zero-padded (padded channels stay exactly zero end-to-end).
    s1, b1 = _fold_bn(*bn1)
    s2, b2 = _fold_bn(*bn2)
    s3, b3 = _fold_bn(*bn3)
    s1_p = _pad_last(s1, w_p).reshape(1, w_p).astype(f32)
    b1_p = _pad_last(b1, w_p).reshape(1, w_p).astype(f32)
    s2_p = _pad_last(s2, w_p).reshape(1, w_p).astype(f32)
    b2_p = _pad_last(b2, w_p).reshape(1, w_p).astype(f32)
    s3_p = _pad_last(s3, cout_p).reshape(1, cout_p).astype(f32)
    b3_p = _pad_last(b3, cout_p).reshape(1, cout_p).astype(f32)

    # Activation: bf16 I/O, no L padding; channel pad only if needed.
    x_b = _pad_last(x_nlc.astype(bf16), cin_p)                            # (B, L, Cin_p)

    # Per-tile halo rows (left/right neighbour row of each L tile); tiny strided
    # gathers, not a full HBM pass.
    zrow = jnp.zeros((B, 1, cin_p), bf16)
    left_rows = x_b[:, block_l - 1::block_l, :][:, :n_lt - 1]             # (B, n_lt-1, Cin_p)
    right_rows = x_b[:, block_l::block_l, :][:, :n_lt - 1]                # (B, n_lt-1, Cin_p)
    left = jnp.concatenate([zrow, left_rows], axis=1)                     # (B, n_lt, Cin_p)
    right = jnp.concatenate([right_rows, zrow], axis=1)                   # (B, n_lt, Cin_p)
    halo = jnp.stack([left, right], axis=2)                               # (B, n_lt, 2, Cin_p)

    kernel = functools.partial(bottleneck_kernel, seq_len=L, block_l=block_l)

    out = pl.pallas_call(
        kernel,
        out_shape=jax.ShapeDtypeStruct((B, L, cout_p), bf16),
        grid_spec=pltpu.PrefetchScalarGridSpec(
            num_scalar_prefetch=0,
            grid=(B, n_lt),
            in_specs=[
                pl.BlockSpec((1, block_l, cin_p), lambda b, i: (b, i, 0)),     # x tile
                pl.BlockSpec((1, 1, 2, cin_p),    lambda b, i: (b, i, 0, 0)),  # halo rows
                pl.BlockSpec((cin_p, w_p),        lambda b, i: (0, 0)),        # conv1 weight
                pl.BlockSpec((3 * w_p, w_p),      lambda b, i: (0, 0)),        # conv2 weight (fused taps)
                pl.BlockSpec((w_p, cout_p),       lambda b, i: (0, 0)),        # conv3 weight
                pl.BlockSpec((1, w_p),            lambda b, i: (0, 0)),        # bn1 scale
                pl.BlockSpec((1, w_p),            lambda b, i: (0, 0)),        # bn1 shift
                pl.BlockSpec((1, w_p),            lambda b, i: (0, 0)),        # bn2 scale
                pl.BlockSpec((1, w_p),            lambda b, i: (0, 0)),        # bn2 shift
                pl.BlockSpec((1, cout_p),         lambda b, i: (0, 0)),        # bn3 scale
                pl.BlockSpec((1, cout_p),         lambda b, i: (0, 0)),        # bn3 shift
            ],
            out_specs=pl.BlockSpec((1, block_l, cout_p), lambda b, i: (b, i, 0)),
        ),
        compiler_params=pltpu.CompilerParams(
            dimension_semantics=("parallel", "parallel"),
            vmem_limit_bytes=_derived_vmem_limit(block_l, cin_p, w_p, cout_p)),
    )(x_b, halo, w1_p, w2_cat, w3_p, s1_p, b1_p, s2_p, b2_p, s3_p, b3_p)

    if cout_p != Cout:
        out = out[:, :, :Cout]
    return out


def bottleneck_forward(x_ncl, conv1_w, conv2_w, conv3_w, bn1, bn2, bn3,
                       *, block_l=None):
    """PyTorch-layout (NCL) entry point.  x_ncl: (B, C, L) -> (B, C, L).

    NOTE: the two transposes round-trip the activation through HBM; a
    channels-last pipeline should call bottleneck_forward_nlc directly (bf16
    in / bf16 out, no layout round trips).
    """
    out_nlc = bottleneck_forward_nlc(jnp.transpose(x_ncl, (0, 2, 1)),
                                     conv1_w, conv2_w, conv3_w,
                                     bn1, bn2, bn3, block_l=block_l)
    return jnp.transpose(out_nlc, (0, 2, 1)).astype(x_ncl.dtype)


def ref_forward(x_ncl, cw1, cw2, cw3, bn1, bn2, bn3):
    """Pure-JAX reference (lax.conv), eval-mode BN; convs take bf16 inputs with
    f32 accumulation, mirroring the kernel's matmul precision."""
    def conv(x, w, pad):
        return lax.conv_general_dilated(
            x.astype(jnp.bfloat16), w.astype(jnp.bfloat16),
            window_strides=(1,), padding=[(pad, pad)],
            dimension_numbers=("NCH", "OIH", "NCH"),
            preferred_element_type=jnp.float32)

    def bn(x, p):
        g, b, m, v = p
        return ((x - m[None, :, None]) / jnp.sqrt(v[None, :, None] + EPS)
                * g[None, :, None] + b[None, :, None])

    out = jax.nn.relu(bn(conv(x_ncl, cw1, 0), bn1))
    out = jax.nn.relu(bn(conv(out, cw2, 1), bn2))
    out = bn(conv(out, cw3, 0), bn3)
    return jax.nn.relu(out + x_ncl)


if __name__ == "__main__":
    def bn_params(keys, c):
        kg, kb, km, kv = keys
        gamma = 1.0 + 0.1 * jax.random.normal(kg, (c,), dtype=jnp.float32)
        beta = 0.1 * jax.random.normal(kb, (c,), dtype=jnp.float32)
        mean = 0.1 * jax.random.normal(km, (c,), dtype=jnp.float32)
        var = 1.0 + 0.1 * jnp.abs(jax.random.normal(kv, (c,), dtype=jnp.float32))
        return gamma, beta, mean, var

    def run_case(seed, B, L, inplanes, planes, block_l):
        width = planes                         # base_width=64, groups=1
        cout = planes * 4
        key = jax.random.PRNGKey(seed)
        keys = jax.random.split(key, 16)

        x = jax.random.normal(keys[0], (B, inplanes, L), dtype=jnp.float32)
        cw1 = (inplanes ** -0.5) * jax.random.normal(
            keys[1], (width, inplanes, 1), dtype=jnp.float32)
        cw2 = ((3 * width) ** -0.5) * jax.random.normal(
            keys[2], (width, width, 3), dtype=jnp.float32)
        cw3 = (width ** -0.5) * jax.random.normal(
            keys[3], (cout, width, 1), dtype=jnp.float32)
        bn1 = bn_params(keys[4:8], width)
        bn2 = bn_params(keys[8:12], width)
        bn3 = bn_params(keys[12:16], cout)

        out = jax.block_until_ready(
            bottleneck_forward(x, cw1, cw2, cw3, bn1, bn2, bn3, block_l=block_l))
        ref = jax.block_until_ready(ref_forward(x, cw1, cw2, cw3, bn1, bn2, bn3))

        assert out.shape == (B, cout, L), out.shape
        err = float(jnp.max(jnp.abs(out.astype(jnp.float32) - ref)))
        # bf16 activation I/O quantizes the identity path and the output; both
        # sides use bf16 matmul inputs with f32 accumulation.
        assert err < 5e-2, f"mismatch vs reference: {err}"
        return err

    # Lane-dense stage (Cin == Cout == 128: no activation channel padding),
    # 3 L tiles with a ragged last tile -> exercises both halo paths and the
    # OOB-row masking of the ragged block.
    run_case(0, B=2, L=40, inplanes=128, planes=32, block_l=16)
    # Tiny-channel config (full channel-padding path) with a single ragged
    # tile and the default block_l heuristic.
    run_case(1, B=2, L=40, inplanes=16, planes=4, block_l=None)

    print("KERNEL_OK")
</pallas_src>

<mosaic_0001>
module attributes {stable_mosaic.version = 11 : i64} {
  func.func @bottleneck_kernel(%arg0: i32, %arg1: i32, %arg2: memref<1x16x128xbf16, #tpu.memory_space<vmem>>, %arg3: memref<1x1x2x128xbf16, #tpu.memory_space<vmem>>, %arg4: memref<128x128xbf16, #tpu.memory_space<vmem>>, %arg5: memref<384x128xbf16, #tpu.memory_space<vmem>>, %arg6: memref<128x128xbf16, #tpu.memory_space<vmem>>, %arg7: memref<1x128xf32, #tpu.memory_space<vmem>>, %arg8: memref<1x128xf32, #tpu.memory_space<vmem>>, %arg9: memref<1x128xf32, #tpu.memory_space<vmem>>, %arg10: memref<1x128xf32, #tpu.memory_space<vmem>>, %arg11: memref<1x128xf32, #tpu.memory_space<vmem>>, %arg12: memref<1x128xf32, #tpu.memory_space<vmem>>, %arg13: memref<1x16x128xbf16, #tpu.memory_space<vmem>>) attributes {dimension_semantics = [#tpu.dimension_semantics<parallel>, #tpu.dimension_semantics<parallel>], iteration_bounds = array<i64: 2, 3>, scalar_prefetch = 0 : i64, scratch_operands = 0 : i64, tpu.core_type = #tpu.core_type<tc>, window_params = [{transform_indices = @transform_0, window_bounds = array<i64: 1, 16, 128>}, {transform_indices = @transform_1, window_bounds = array<i64: 1, 1, 2, 128>}, {pipeline_mode = #tpu.pipeline_mode<synchronous>, transform_indices = @transform_2, window_bounds = array<i64: 128, 128>}, {pipeline_mode = #tpu.pipeline_mode<synchronous>, transform_indices = @transform_3, window_bounds = array<i64: 384, 128>}, {pipeline_mode = #tpu.pipeline_mode<synchronous>, transform_indices = @transform_4, window_bounds = array<i64: 128, 128>}, {pipeline_mode = #tpu.pipeline_mode<synchronous>, transform_indices = @transform_5, window_bounds = array<i64: 1, 128>}, {pipeline_mode = #tpu.pipeline_mode<synchronous>, transform_indices = @transform_6, window_bounds = array<i64: 1, 128>}, {pipeline_mode = #tpu.pipeline_mode<synchronous>, transform_indices = @transform_7, window_bounds = array<i64: 1, 128>}, {pipeline_mode = #tpu.pipeline_mode<synchronous>, transform_indices = @transform_8, window_bounds = array<i64: 1, 128>}, {pipeline_mode = #tpu.pipeline_mode<synchronous>, transform_indices = @transform_9, window_bounds = array<i64: 1, 128>}, {pipeline_mode = #tpu.pipeline_mode<synchronous>, transform_indices = @transform_10, window_bounds = array<i64: 1, 128>}, {transform_indices = @transform_11, window_bounds = array<i64: 1, 16, 128>}]} {
    %c16_i32 = arith.constant 16 : i32
    %0 = arith.muli %arg1, %c16_i32 : i32
    %c0 = arith.constant 0 : index
    %c0_0 = arith.constant 0 : index
    %c0_1 = arith.constant 0 : index
    %1 = vector.load %arg2[%c0, %c0_0, %c0_1] : memref<1x16x128xbf16, #tpu.memory_space<vmem>>, vector<1x16x128xbf16>
    %2 = vector.shape_cast %1 : vector<1x16x128xbf16> to vector<16x128xbf16>
    %c0_2 = arith.constant 0 : index
    %c0_3 = arith.constant 0 : index
    %c0_4 = arith.constant 0 : index
    %c0_5 = arith.constant 0 : index
    %3 = vector.load %arg3[%c0_2, %c0_3, %c0_4, %c0_5] : memref<1x1x2x128xbf16, #tpu.memory_space<vmem>>, vector<1x1x2x128xbf16>
    %4 = vector.shape_cast %3 : vector<1x1x2x128xbf16> to vector<2x128xbf16>
    %c0_6 = arith.constant 0 : index
    %c0_7 = arith.constant 0 : index
    %5 = vector.load %arg4[%c0_6, %c0_7] : memref<128x128xbf16, #tpu.memory_space<vmem>>, vector<128x128xbf16>
    %c0_8 = arith.constant 0 : index
    %c0_9 = arith.constant 0 : index
    %6 = vector.load %arg7[%c0_8, %c0_9] : memref<1x128xf32, #tpu.memory_space<vmem>>, vector<1x128xf32>
    %c0_10 = arith.constant 0 : index
    %c0_11 = arith.constant 0 : index
    %7 = vector.load %arg8[%c0_10, %c0_11] : memref<1x128xf32, #tpu.memory_space<vmem>>, vector<1x128xf32>
    %cst = arith.constant dense<0.000000e+00> : vector<16x128xf32>
    %8 = tpu.matmul %2, %5, %cst {dimension_numbers = #tpu.dot_dimension_numbers<[1], [0], [0], [1], [0, 0, 1, 1], [], []>} : vector<16x128xbf16>, vector<128x128xbf16>, vector<16x128xf32> -> vector<16x128xf32>
    %9 = vector.broadcast %6 : vector<1x128xf32> to vector<16x128xf32>
    %10 = arith.mulf %8, %9 : vector<16x128xf32>
    %11 = vector.broadcast %7 : vector<1x128xf32> to vector<16x128xf32>
    %12 = arith.addf %10, %11 : vector<16x128xf32>
    %cst_12 = arith.constant 0.000000e+00 : f32
    %13 = vector.broadcast %cst_12 : f32 to vector<16x128xf32>
    %14 = arith.maximumf %12, %13 : vector<16x128xf32>
    %cst_13 = arith.constant dense<0.000000e+00> : vector<2x128xf32>
    %15 = tpu.matmul %4, %5, %cst_13 {dimension_numbers = #tpu.dot_dimension_numbers<[1], [0], [0], [1], [0, 0, 1, 1], [], []>} : vector<2x128xbf16>, vector<128x128xbf16>, vector<2x128xf32> -> vector<2x128xf32>
    %16 = vector.broadcast %6 : vector<1x128xf32> to vector<2x128xf32>
    %17 = arith.mulf %15, %16 : vector<2x128xf32>
    %18 = vector.broadcast %7 : vector<1x128xf32> to vector<2x128xf32>
    %19 = arith.addf %17, %18 : vector<2x128xf32>
    %cst_14 = arith.constant 0.000000e+00 : f32
    %20 = vector.broadcast %cst_14 : f32 to vector<2x128xf32>
    %21 = arith.maximumf %19, %20 : vector<2x128xf32>
    %22 = tpu.iota {dimensions = array<i32: 0>} : vector<16x1xi32>
    %23 = vector.broadcast %0 : i32 to vector<16x1xi32>
    %24 = arith.addi %23, %22 : vector<16x1xi32>
    %c40_i32 = arith.constant 40 : i32
    %25 = vector.broadcast %c40_i32 : i32 to vector<16x1xi32>
    %26 = arith.cmpi slt, %24, %25 : vector<16x1xi32>
    %cst_15 = arith.constant 0.000000e+00 : f32
    %27 = vector.shape_cast %26 : vector<16x1xi1> to vector<16x1xi1>
    %28 = vector.broadcast %27 : vector<16x1xi1> to vector<16x128xi1>
    %29 = vector.broadcast %cst_15 : f32 to vector<16x128xf32>
    %30 = arith.select %28, %14, %29 : vector<16x128xi1>, vector<16x128xf32>
    %c0_i32 = arith.constant 0 : i32
    %31 = arith.cmpi sgt, %arg1, %c0_i32 : i32
    %c16_i32_16 = arith.constant 16 : i32
    %32 = arith.addi %0, %c16_i32_16 : i32
    %c40_i32_17 = arith.constant 40 : i32
    %33 = arith.cmpi slt, %32, %c40_i32_17 : i32
    %34 = vector.extract_strided_slice %21 {offsets = [0, 0], sizes = [1, 128], strides = [1, 1]} : vector<2x128xf32> to vector<1x128xf32>
    %cst_18 = arith.constant 0.000000e+00 : f32
    %35 = vector.broadcast %cst_18 : f32 to vector<1x128xf32>
    %36 = arith.select %31, %34, %35 : vector<1x128xf32>
    %37 = vector.extract_strided_slice %21 {offsets = [1, 0], sizes = [1, 128], strides = [1, 1]} : vector<2x128xf32> to vector<1x128xf32>
    %cst_19 = arith.constant 0.000000e+00 : f32
    %38 = vector.broadcast %cst_19 : f32 to vector<1x128xf32>
    %39 = arith.select %33, %37, %38 : vector<1x128xf32>
    %c0_i32_20 = arith.constant 0 : i32
    %40 = vector.broadcast %c0_i32_20 : i32 to vector<16x1xi32>
    %41 = arith.cmpi eq, %22, %40 : vector<16x1xi32>
    %c15_i32 = arith.constant 15 : i32
    %42 = vector.broadcast %c15_i32 : i32 to vector<16x1xi32>
    %43 = arith.cmpi eq, %22, %42 : vector<16x1xi32>
    %c1_i32 = arith.constant 1 : i32
    %44 = tpu.dynamic_rotate %30 by %c1_i32 dim 0 : vector<16x128xf32>, i32 -> vector<16x128xf32>
    %45 = vector.shape_cast %41 : vector<16x1xi1> to vector<16x1xi1>
    %46 = vector.broadcast %45 : vector<16x1xi1> to vector<16x128xi1>
    %47 = vector.shape_cast %36 : vector<1x128xf32> to vector<1x128xf32>
    %48 = vector.broadcast %47 : vector<1x128xf32> to vector<16x128xf32>
    %49 = arith.select %46, %48, %44 : vector<16x128xi1>, vector<16x128xf32>
    %c15_i32_21 = arith.constant 15 : i32
    %50 = tpu.dynamic_rotate %30 by %c15_i32_21 dim 0 : vector<16x128xf32>, i32 -> vector<16x128xf32>
    %51 = vector.shape_cast %43 : vector<16x1xi1> to vector<16x1xi1>
    %52 = vector.broadcast %51 : vector<16x1xi1> to vector<16x128xi1>
    %53 = vector.shape_cast %39 : vector<1x128xf32> to vector<1x128xf32>
    %54 = vector.broadcast %53 : vector<1x128xf32> to vector<16x128xf32>
    %55 = arith.select %52, %54, %50 : vector<16x128xi1>, vector<16x128xf32>
    %56 = tpu.concatenate %49, %30, %55 in 1 : vector<16x128xf32>, vector<16x128xf32>, vector<16x128xf32> -> vector<16x384xf32>
    %57 = arith.truncf %56 : vector<16x384xf32> to vector<16x384xbf16>
    %c0_22 = arith.constant 0 : index
    %c0_23 = arith.constant 0 : index
    %58 = vector.load %arg5[%c0_22, %c0_23] : memref<384x128xbf16, #tpu.memory_space<vmem>>, vector<384x128xbf16>
    %cst_24 = arith.constant dense<0.000000e+00> : vector<16x128xf32>
    %59 = tpu.matmul %57, %58, %cst_24 {dimension_numbers = #tpu.dot_dimension_numbers<[1], [0], [0], [1], [0, 0, 1, 1], [], []>} : vector<16x384xbf16>, vector<384x128xbf16>, vector<16x128xf32> -> vector<16x128xf32>
    %c0_25 = arith.constant 0 : index
    %c0_26 = arith.constant 0 : index
    %60 = vector.load %arg9[%c0_25, %c0_26] : memref<1x128xf32, #tpu.memory_space<vmem>>, vector<1x128xf32>
    %61 = vector.broadcast %60 : vector<1x128xf32> to vector<16x128xf32>
    %62 = arith.mulf %59, %61 : vector<16x128xf32>
    %c0_27 = arith.constant 0 : index
    %c0_28 = arith.constant 0 : index
    %63 = vector.load %arg10[%c0_27, %c0_28] : memref<1x128xf32, #tpu.memory_space<vmem>>, vector<1x128xf32>
    %64 = vector.broadcast %63 : vector<1x128xf32> to vector<16x128xf32>
    %65 = arith.addf %62, %64 : vector<16x128xf32>
    %cst_29 = arith.constant 0.000000e+00 : f32
    %66 = vector.broadcast %cst_29 : f32 to vector<16x128xf32>
    %67 = arith.maximumf %65, %66 : vector<16x128xf32>
    %68 = arith.truncf %67 : vector<16x128xf32> to vector<16x128xbf16>
    %c0_30 = arith.constant 0 : index
    %c0_31 = arith.constant 0 : index
    %69 = vector.load %arg6[%c0_30, %c0_31] : memref<128x128xbf16, #tpu.memory_space<vmem>>, vector<128x128xbf16>
    %cst_32 = arith.constant dense<0.000000e+00> : vector<16x128xf32>
    %70 = tpu.matmul %68, %69, %cst_32 {dimension_numbers = #tpu.dot_dimension_numbers<[1], [0], [0], [1], [0, 0, 1, 1], [], []>} : vector<16x128xbf16>, vector<128x128xbf16>, vector<16x128xf32> -> vector<16x128xf32>
    %c0_33 = arith.constant 0 : index
    %c0_34 = arith.constant 0 : index
    %71 = vector.load %arg11[%c0_33, %c0_34] : memref<1x128xf32, #tpu.memory_space<vmem>>, vector<1x128xf32>
    %72 = vector.broadcast %71 : vector<1x128xf32> to vector<16x128xf32>
    %73 = arith.mulf %70, %72 : vector<16x128xf32>
    %c0_35 = arith.constant 0 : index
    %c0_36 = arith.constant 0 : index
    %74 = vector.load %arg12[%c0_35, %c0_36] : memref<1x128xf32, #tpu.memory_space<vmem>>, vector<1x128xf32>
    %75 = vector.broadcast %74 : vector<1x128xf32> to vector<16x128xf32>
    %76 = arith.addf %73, %75 : vector<16x128xf32>
    %77 = arith.extf %2 : vector<16x128xbf16> to vector<16x128xf32>
    %78 = arith.addf %76, %77 : vector<16x128xf32>
    %cst_37 = arith.constant 0.000000e+00 : f32
    %79 = vector.broadcast %cst_37 : f32 to vector<16x128xf32>
    %80 = arith.maximumf %78, %79 : vector<16x128xf32>
    %81 = arith.truncf %80 : vector<16x128xf32> to vector<16x128xbf16>
    %c0_38 = arith.constant 0 : index
    %c0_39 = arith.constant 0 : index
    %c0_40 = arith.constant 0 : index
    %82 = vector.load %arg13[%c0_38, %c0_39, %c0_40] : memref<1x16x128xbf16, #tpu.memory_space<vmem>>, vector<1x16x128xbf16>
    %83 = vector.shape_cast %82 : vector<1x16x128xbf16> to vector<16x128xbf16>
    %84 = vector.shape_cast %81 : vector<16x128xbf16> to vector<1x16x128xbf16>
    tpu.vector_store %arg13[%c0_38, %c0_39, %c0_40], %84 {strides = array<i32>} : memref<1x16x128xbf16, #tpu.memory_space<vmem>>, vector<1x16x128xbf16>,
    return
  }
  func.func @transform_0(%arg0: i32, %arg1: i32) -> (i32, i32, i32) {
    %c0_i32 = arith.constant 0 : i32
    %c0_i32_0 = arith.constant 0 : i32
    return %arg0, %arg1, %c0_i32 : i32, i32, i32
  }
  func.func @transform_1(%arg0: i32, %arg1: i32) -> (i32, i32, i32, i32) {
    %c0_i32 = arith.constant 0 : i32
    %c0_i32_0 = arith.constant 0 : i32
    %c0_i32_1 = arith.constant 0 : i32
    return %arg0, %arg1, %c0_i32, %c0_i32_0 : i32, i32, i32, i32
  }
  func.func @transform_2(%arg0: i32, %arg1: i32) -> (i32, i32) {
    %c0_i32 = arith.constant 0 : i32
    %c0_i32_0 = arith.constant 0 : i32
    %c0_i32_1 = arith.constant 0 : i32
    return %c0_i32, %c0_i32_0 : i32, i32
  }
  func.func @transform_3(%arg0: i32, %arg1: i32) -> (i32, i32) {
    %c0_i32 = arith.constant 0 : i32
    %c0_i32_0 = arith.constant 0 : i32
    %c0_i32_1 = arith.constant 0 : i32
    return %c0_i32, %c0_i32_0 : i32, i32
  }
  func.func @transform_4(%arg0: i32, %arg1: i32) -> (i32, i32) {
    %c0_i32 = arith.constant 0 : i32
    %c0_i32_0 = arith.constant 0 : i32
    %c0_i32_1 = arith.constant 0 : i32
    return %c0_i32, %c0_i32_0 : i32, i32
  }
  func.func @transform_5(%arg0: i32, %arg1: i32) -> (i32, i32) {
    %c0_i32 = arith.constant 0 : i32
    %c0_i32_0 = arith.constant 0 : i32
    %c0_i32_1 = arith.constant 0 : i32
    return %c0_i32, %c0_i32_0 : i32, i32
  }
  func.func @transform_6(%arg0: i32, %arg1: i32) -> (i32, i32) {
    %c0_i32 = arith.constant 0 : i32
    %c0_i32_0 = arith.constant 0 : i32
    %c0_i32_1 = arith.constant 0 : i32
    return %c0_i32, %c0_i32_0 : i32, i32
  }
  func.func @transform_7(%arg0: i32, %arg1: i32) -> (i32, i32) {
    %c0_i32 = arith.constant 0 : i32
    %c0_i32_0 = arith.constant 0 : i32
    %c0_i32_1 = arith.constant 0 : i32
    return %c0_i32, %c0_i32_0 : i32, i32
  }
  func.func @transform_8(%arg0: i32, %arg1: i32) -> (i32, i32) {
    %c0_i32 = arith.constant 0 : i32
    %c0_i32_0 = arith.constant 0 : i32
    %c0_i32_1 = arith.constant 0 : i32
    return %c0_i32, %c0_i32_0 : i32, i32
  }
  func.func @transform_9(%arg0: i32, %arg1: i32) -> (i32, i32) {
    %c0_i32 = arith.constant 0 : i32
    %c0_i32_0 = arith.constant 0 : i32
    %c0_i32_1 = arith.constant 0 : i32
    return %c0_i32, %c0_i32_0 : i32, i32
  }
  func.func @transform_10(%arg0: i32, %arg1: i32) -> (i32, i32) {
    %c0_i32 = arith.constant 0 : i32
    %c0_i32_0 = arith.constant 0 : i32
    %c0_i32_1 = arith.constant 0 : i32
    return %c0_i32, %c0_i32_0 : i32, i32
  }
  func.func @transform_11(%arg0: i32, %arg1: i32) -> (i32, i32, i32) {
    %c0_i32 = arith.constant 0 : i32
    %c0_i32_0 = arith.constant 0 : i32
    return %arg0, %arg1, %c0_i32 : i32, i32, i32
  }
}

</mosaic_0001>

<bundles_post_ra>
// kernel: tpu_custom_call.1
= control target key start
LH: loop header
LB: loop body
LE: loop exit
PB: predicated region body
PF: predicated region fallthrough
CT: control target
= control target key end

     0   :  { %s2478_s0 = inlined_call_operand.hbm [shape: bf16[2,40,128], index: 0, kind: input, shape index: {}]   ;;  %s2479_s1 = inlined_call_operand.hbm [shape: bf16[2,3,2,128], index: 1, kind: input, shape index: {}]   ;;  %s2480_s2 = inlined_call_operand.hbm [shape: bf16[128,128], index: 2, kind: input, shape index: {}]   ;;  %s2481_s3 = inlined_call_operand.hbm [shape: bf16[384,128], index: 3, kind: input, shape index: {}]   ;;  %s2482_s4 = inlined_call_operand.hbm [shape: bf16[128,128], index: 4, kind: input, shape index: {}]   ;;  %s2483_s5 = inlined_call_operand.vmem [shape: f32[1,128], index: 5, kind: input, shape index: {}]   ;;  %s2484_s6 = inlined_call_operand.vmem [shape: f32[1,128], index: 6, kind: input, shape index: {}]   ;;  %s2485_s7 = inlined_call_operand.vmem [shape: f32[1,128], index: 7, kind: input, shape index: {}]   ;;  %s2486_s8 = inlined_call_operand.vmem [shape: f32[1,128], index: 8, kind: input, shape index: {}]   ;;  %s2487_s9 = inlined_call_operand.vmem [shape: f32[1,128], index: 9, kind: input, shape index: {}]   ;;  %s2488_s10 = inlined_call_operand.vmem [shape: f32[1,128], index: 10, kind: input, shape index: {}]   ;;  %s2489_s11 = inlined_call_operand.hbm [shape: bf16[2,40,128], index: 11, kind: output, shape index: {}]  }
   0x1   :  { %2503 = sst [smem:[#allocation26_spill]] %s2483_s5 }
   0x2   :  { %2504 = sst [smem:[#allocation27_spill]] %s2484_s6 }
   0x3   :  { %2505 = sst [smem:[#allocation28_spill]] %s2485_s7 }
   0x4   :  { %2506 = sst [smem:[#allocation29_spill]] %s2486_s8 }
   0x5   :  { %2507 = sst [smem:[#allocation30_spill]] %s2487_s9 }
   0x6   :  { %2508 = sst [smem:[#allocation31_spill]] %s2488_s10 }
   0x7   :  { %2509 = sst [smem:[#allocation32_spill]] %s2489_s11 }
   0x8   :  { %16 = vsyncpa [#allocation3], 0 }
   0x9   :  { %18 = vsyncpa [#allocation3 + $0x1], 0 }
   0xa   :  { %19 = vsyncpa [#allocation6], 0 }
   0xb   :  { %21 = vsyncpa [#allocation6 + $0x1], 0 }
   0xc   :  { %22 = vsyncpa [#allocation9], 0 }
   0xd   :  { %23 = vsyncpa [#allocation4], 0 }
   0xe   :  { %25 = vsyncpa [#allocation4 + $0x1], 0  ;;  %s2068_s17 = smov 0   ;;  %s2070_s18 = smov 0  }
   0xf   :  { %s2072_s19 = smov 0   ;;  %s2074_s20 = smov 0  }
  0x10   :  { %s2076_s21 = smov 0   ;;  %s2078_s22 = smov 0  }
  0x11   :  { %s2080_s23 = smov 0   ;;  %s2082_s24 = smov 0  }
  0x12 LB: > { %2510 = sst [smem:[#allocation17_spill]] %s1964_s17  ;;  %s2109_s25 = sadd.s32 4294967295, %s1992_s24   ;;  %s1992_s24 = sphi %s2082_s24, %s31_s24   ;;  %s1988_s23 = sphi %s2080_s23, %s2559_s23   ;;  %s1984_s22 = sphi %s2078_s22, %s2558_s22   ;;  %s1980_s21 = sphi %s2076_s21, %s2557_s21   ;;  %s1976_s20 = sphi %s2074_s20, %s2556_s20   ;;  %s1972_s19 = sphi %s2072_s19, %s2555_s19   ;;  %s1968_s18 = sphi %s2070_s18, %s2554_s18   ;;  %s1964_s17 = sphi %s2068_s17, %s2553_s17  }
  0x13   : > { %2511 = sst [smem:[#allocation18_spill]] %s1976_s20  ;;  %s1358_s26 = sadd.s32 4294967294, %s1992_s24  }
  0x14   : > { %2512 = sst [smem:[#allocation19_spill]] %s1980_s21  ;;  %s40_s27 = sadd.s32 1, %s1984_s22 }
  0x15   : > { %2513 = sst [smem:[#allocation20_spill]] %s2109_s25  ;;  %s43_s28 = sadd.s32 1, %s1988_s23 }
  0x16   : > { %p41_p0 = scmp.ge.s32.totalorder %s40_s27, 3  ;;  %s52_s29 = sadd.s32 1, %s1972_s19 }
  0x17   : > { %p59_p1 = scmp.ne.s32.totalorder %s1972_s19, %s1968_s18  ;;  %p60_p2 = scmp.eq.s32.totalorder %s1992_s24, 0 }
  0x18   : > { %s2561_s27 = smov (%p41_p0, %s40_s27), 0  ;;  %s2563_s28 = smov (!%p41_p0, %s43_s28), %s1988_s23 }
  0x19   : > { %2514 = sst [smem:[#allocation21_spill]] %s2561_s27  ;;  %s48_s30 = ssub.s32 %s1984_s22, %s2561_s27 }
  0x1a   : > { %p2123_p3 = por %p60_p2, %p59_p1  ;;  %p45_p4 = scmp.ge.s32.totalorder %s2563_s28, 2 }
  0x1b   : > { %p65_p5 = scmp.ne.s32.totalorder %s1968_s18, %s1964_s17  ;;  %p2496_p6 = scmp.eq.s32.totalorder %s2109_s25, 0 }
  0x1c   : > { %s2515_s12 = scalar_select %p2123_p3, 1, 0 }
  0x1d   : > { %p308_p7 = scmp.eq.s32.totalorder %s2109_s25, 5  ;;  %s2565_s28 = smov (%p45_p4, %s2563_s28), 0 }
  0x1e   : > { %2516 = sst [smem:[#allocation22_spill]] %s2565_s28  ;;  %p2135_p8 = por %p2496_p6, %p65_p5 }
  0x1f   : > { %p2139_p9 = por %p308_p7, %p59_p1  ;;  %s47_s15 = ssub.s32 %s1988_s23, %s2565_s28 }
  0x20   : > { %s2517_s13 = scalar_select %p2135_p8, 1, 0 }
  0x21   : > { %s2518_s14 = scalar_select %p2139_p9, 1, 0 }
  0x22   : > { %p314_p10 = scmp.eq.s32.totalorder %s1358_s26, 5  ;;  %s49_s16 = sor.u32 %s48_s30, %s47_s15 }
  0x23   : > { %2519 = sst [smem:[#allocation23_spill]] %s2518_s14  ;;  %p1359_p11 = scmp.ge.s32.totalorder %s1992_s24, 1 }
  0x24   : > { %p50_p12 = scmp.eq.s32.totalorder %s49_s16, 0  ;;  %p2146_p13 = por %p314_p10, %p65_p5 }
  0x25   : > { %p321_p0 = scmp.lt.s32.totalorder %s1992_s24, 7  ;;  %s1994_s21 = smov [#allocation8]  }
  0x26   : > { %s2520_s27 = scalar_select %p2146_p13, 1, 0 }
  0x27   : > { %s2152_s17 = scalar_select %p50_p12, %s1972_s19, %s52_s29  }
  0x28   : > { %2521 = sst [smem:[#allocation24_spill]] %s2520_s27  ;;  %p2154_p2 = pnand %p1359_p11, %p321_p0 }
  0x29   : > { %2522 = sst [smem:[#allocation25_spill]] %s2152_s17  ;;  %s346_s28 = sshll.u32 %s1994_s21, 4  ;;  %s347_s28 = int_to_ptr.vmem [resolvable:$true] %s346_s28 }
  0x2a   : > { %s2523_s11 = scalar_select %p2154_p2, 1, 0 }
  0x2b   : > { %p1604_p1 = pneg %p2154_p2  ;;  %s1742_s29 = scalar_lea.hbm %s2481_s3, 3072 }
  0x2c   : > { %p1743_p5 = scmp.ne.s32.totalorder %s2481_s3, %s1742_s29  ;;  %p1749_p12 = scmp.lt.u32.totalorder %s1742_s29, %s2481_s3 }
  0x2d   : > { %p2162_p4 = pnand %p1604_p1, %p2496_p6 }
  0x2f   : > { %p2174_p7 = pneg %p2162_p4 }
  0x31   : > { %p1745_p10 = pnand %p2174_p7, %p1743_p5 }
  0x33   : > { %p1746_p11 = pneg %p1745_p10 }
  0x35   : > { %p1751_p0 = pnand %p1749_p12, %p1746_p11 }
  0x37   : > { %1754 = shalt.err (!%p1751_p0)
}
  0x38   : > { %s1755_s30 = scalar_lea.vmem %s347_s28, 3072  ;;  %p1763_p9 = scmp.lt.s32.totalorder %s347_s28, %s347_s28 }
  0x39   : > { %p1756_p1 = scmp.ne.s32.totalorder %s347_s28, %s1755_s30  ;;  %p1764_p8 = scmp.lt.s32.totalorder %s1755_s30, %s1755_s30 }
  0x3b   : > { %p1758_p6 = pnand %p1756_p1, %p2174_p7  ;;  %p1765_p2 = por %p1764_p8, %p1763_p9 }
  0x3d   : > { %p1759_p13 = pneg %p1758_p6 }
  0x3f   : > { %p1766_p3 = pnand %p1765_p2, %p1759_p13 }
  0x41   : > { %1769 = shalt.err (!%p1766_p3)
}
  0x42   : > { %s1995_s17 = smov 64   ;;  %s1996_s15 = smov 4  }
  0x43   : > { %1610 = dma.hbm_to_vmem [thread:$0]  (!%p2162_p4), %s2481_s3, 3072, %s347_s28, [#allocation9], %s1995_s17, %s1995_s17, %s1996_s15  }
  0x44   : > { %s1997_s16 = smov [#allocation7]   ;;  %s1998_s10 = smov [#allocation10]  }
  0x45   : > { %s333_s21 = sshll.u32 %s1997_s16, 4  ;;  %s359_s30 = sshll.u32 %s1998_s10, 4  ;;  %s334_s21 = int_to_ptr.vmem [resolvable:$true] %s333_s21  ;;  %s360_s30 = int_to_ptr.vmem [resolvable:$true] %s359_s30 }
  0x46   : > { %s1770_s7 = scalar_lea.hbm %s2480_s2, 1024 }
  0x47   : > { %p1771_p3 = scmp.ne.s32.totalorder %s2480_s2, %s1770_s7  ;;  %p1777_p9 = scmp.lt.u32.totalorder %s1770_s7, %s2480_s2 }
  0x49   : > { %p1773_p6 = pnand %p1771_p3, %p2174_p7 }
  0x4b   : > { %p1774_p8 = pneg %p1773_p6 }
  0x4d   : > { %p1779_p13 = pnand %p1777_p9, %p1774_p8 }
  0x4f   : > { %1782 = shalt.err (!%p1779_p13)
}
  0x50   : > { %s1783_s28 = scalar_lea.vmem %s334_s21, 1024  ;;  %p1791_p11 = scmp.lt.s32.totalorder %s334_s21, %s334_s21 }
  0x51   : > { %p1784_p2 = scmp.ne.s32.totalorder %s334_s21, %s1783_s28  ;;  %p1792_p12 = scmp.lt.s32.totalorder %s1783_s28, %s1783_s28 }
  0x53   : > { %p1786_p5 = pnand %p1784_p2, %p2174_p7  ;;  %p1793_p0 = por %p1792_p12, %p1791_p11 }
  0x55   : > { %p1787_p10 = pneg %p1786_p5 }
  0x57   : > { %p1794_p1 = pnand %p1793_p0, %p1787_p10 }
  0x59   : > { %1797 = shalt.err (!%p1794_p1)
}
  0x5a   : > { %1607 = dma.hbm_to_vmem [thread:$0]  (!%p2162_p4), %s2480_s2, 1024, %s334_s21, [#allocation6], %s1995_s17, %s1995_s17, %s1996_s15  }
  0x5b   : > { %s1798_s9 = scalar_lea.hbm %s2482_s4, 1024 }
  0x5c   : > { %p1799_p3 = scmp.ne.s32.totalorder %s2482_s4, %s1798_s9  ;;  %p1805_p9 = scmp.lt.u32.totalorder %s1798_s9, %s2482_s4 }
  0x5e   : > { %p1801_p6 = pnand %p1799_p3, %p2174_p7 }
  0x60   : > { %p1802_p8 = pneg %p1801_p6 }
  0x62   : > { %p1807_p13 = pnand %p1805_p9, %p1802_p8 }
  0x64   : > { %1810 = shalt.err (!%p1807_p13)
}
  0x65   : > { %s1811_s29 = scalar_lea.vmem %s360_s30, 1024  ;;  %p1819_p11 = scmp.lt.s32.totalorder %s360_s30, %s360_s30 }
  0x66   : > { %p1812_p2 = scmp.ne.s32.totalorder %s360_s30, %s1811_s29  ;;  %p1820_p12 = scmp.lt.s32.totalorder %s1811_s29, %s1811_s29 }
  0x68   : > { %p1814_p5 = pnand %p1812_p2, %p2174_p7  ;;  %p1821_p0 = por %p1820_p12, %p1819_p11 }
  0x6a   : > { %p1815_p10 = pneg %p1814_p5 }
  0x6c   : > { %p1822_p1 = pnand %p1821_p0, %p1815_p10 }
  0x6e   : > { %1825 = shalt.err (!%p1822_p1)
}
  0x6f   : > { %1613 = dma.hbm_to_vmem [thread:$0]  (!%p2162_p4), %s2482_s4, 1024, %s360_s30, [#allocation9], %s1995_s17, %s1995_s17, %s1996_s15  }
  0x70   : > { %p1363_p3 = scmp.ge.s32.totalorder %s1992_s24, 6 }
  0x71   : > { %p2526_p7 = scmp.ne.s32.totalorder (!%p1363_p3), %s2515_s12, 0 }
  0x72   : > { %387 = sbr.rel (%p1363_p3) target bundleno = 185 (0xb9), region = 52 }
  0x79   : > { %390 = sbr.rel (!%p2526_p7) target bundleno = 158 (0x9e), region = 56  ;;  %s391_s27 = sand.u32 (%p2526_p7), 1, %s1972_s19  }
  0x7a   : > { %s1365_s28 = sshll.u32 (%p2526_p7), %s1984_s22, 1  ;;  %s1364_s5 = sshll.u32 (%p2526_p7), %s391_s27, 3 }
  0x7b   : > { %s397_s6 = ssub.s32 (%p2526_p7), 5, %s1365_s28  ;;  %s2243_s8 = scalar_lea.sflag (%p2526_p7), [#allocation3], %s391_s27 }
  0x7c   : > { %p398_p6 = scmp.lt.s32.totalorder (%p2526_p7), %s397_s6, 2  ;;  %s395_s17 = scalar_lea.vmem (%p2526_p7), [#allocation2], %s1364_s5 }
  0x80   : > { %s2567_s6 = smov (!%p398_p6, %s397_s6), 2 }
  0x81   : > { %s2240_s26 = sshll.u32 %s2567_s6, 6 }
  0x82   : > { %s402_s7 = ssub.s32 128, %s2240_s26 }
  0x83   : > { %403 = vsyncadd %s2243_s8, %s402_s7  ;;  %p1367_p4 = scmp.ne.s32.totalorder %s2240_s26, 0  ;;  %s1585_s15 = smul.u32 5, %s1988_s23 }
  0x84   : > { %s410_s30 = sshll.u32 %s395_s17, 4  ;;  %s1830_s27 = scalar_lea.hbm %s2478_s0, 640  ;;  %s2248_s30 = int_to_ptr.vmem [resolvable:$true] %s410_s30 }
  0x85   : > { %s406_s9 = sadd.s32 %s1585_s15, %s1365_s28 }
  0x86   : > { %s1368_s10 = sshll.u32 %s406_s9, 6 }
  0x87   : > { %s2253_s14 = scalar_lea.hbm %s2478_s0, %s1368_s10 }
  0x88   : > { %s1826_s29 = scalar_lea.hbm %s2253_s14, %s2240_s26  ;;  %p1831_p2 = scmp.lt.u32.totalorder %s2253_s14, %s2478_s0 }
  0x89   : > { %p1827_p8 = scmp.ne.s32.totalorder %s2253_s14, %s1826_s29  ;;  %p1832_p5 = scmp.lt.u32.totalorder %s1830_s27, %s1826_s29 }
  0x8a   : > { %p1834_p11 = scmp.lt.u32.totalorder %s1826_s29, %s2253_s14 }
  0x8b   : > { %p1828_p9 = pnand %p1827_p8, %p1367_p4  ;;  %p1833_p10 = por %p1832_p5, %p1831_p2 }
  0x8d   : > { %p1829_p13 = pneg %p1828_p9  ;;  %p1835_p12 = por %p1834_p11, %p1833_p10 }
  0x8f   : > { %p1836_p0 = pnand %p1835_p12, %p1829_p13 }
  0x91   : > { %1839 = shalt.err (!%p1836_p0)
}
  0x92   : > { %s1840_s6 = scalar_lea.vmem %s2248_s30, %s2240_s26  ;;  %s1999_s7 = smov [#allocation2]  }
  0x93   : > { %p1841_p1 = scmp.ne.s32.totalorder %s2248_s30, %s1840_s6  ;;  %s1844_s17 = sshll.u32 %s1999_s7, 4  ;;  %s1845_s17 = int_to_ptr.vmem [resolvable:$false] %s1844_s17 }
  0x94   : > { %s1846_s15 = scalar_lea.vmem %s1845_s17, 256  ;;  %p1847_p6 = scmp.lt.s32.totalorder %s2248_s30, %s1845_s17 }
  0x95   : > { %p1842_p3 = pnand %p1841_p1, %p1367_p4  ;;  %p1848_p8 = scmp.lt.s32.totalorder %s1846_s15, %s1840_s6 }
  0x97   : > { %p1843_p7 = pneg %p1842_p3  ;;  %p1849_p9 = por %p1848_p8, %p1847_p6 }
  0x99   : > { %p1850_p2 = pnand %p1849_p9, %p1843_p7 }
  0x9b   : > { %1853 = shalt.err (!%p1850_p2)
}
  0x9c   : > { %s2000_s9 = smov 64   ;;  %s2001_s10 = smov 4  }
  0x9d   : > { %416 = dma.hbm_to_vmem [thread:$0]  (%p1367_p4), %s2253_s14, %s2240_s26, %s2248_s30, %s2243_s8, %s2000_s9, %s2000_s9, %s2001_s10  }
  0x9e PF: > { %s420_s20 = sand.u32 1, %s1992_s24   ;;  %s422_s25 = sand.u32 1, %s1972_s19  }
  0x9f   : > { %s1586_s29 = smul.u32 3, %s1988_s23  ;;  %s423_s16 = scalar_lea.vmem [#allocation5], %s422_s25 }
  0xa0   : > { %s432_s21 = sshll.u32 %s423_s16, 4  ;;  %s421_s26 = scalar_lea.sflag [#allocation6], %s420_s20  ;;  %s2284_s21 = int_to_ptr.vmem [resolvable:$true] %s432_s21 }
  0xa1   : > { %s428_s27 = sadd.s32 %s1984_s22, %s1586_s29  ;;  %p2527_p13 = scmp.ne.s32.totalorder %s2515_s12, 0 }
  0xa2   : > { %s1371_s28 = sshll.u32 %s428_s27, 4  ;;  %s1858_s17 = scalar_lea.hbm %s2479_s1, 96 }
  0xa3   : > { %s430_s7 = scalar_lea.hbm %s2479_s1, %s1371_s28 }
  0xa4   : > { %s1854_s8 = scalar_lea.hbm %s430_s7, 16  ;;  %p1859_p11 = scmp.lt.u32.totalorder %s430_s7, %s2479_s1 }
  0xa5   : > { %p1855_p4 = scmp.ne.s32.totalorder %s430_s7, %s1854_s8  ;;  %p1860_p12 = scmp.lt.u32.totalorder %s1858_s17, %s1854_s8 }
  0xa6   : > { %p1862_p1 = scmp.lt.u32.totalorder %s1854_s8, %s430_s7 }
  0xa7   : > { %p1856_p5 = pnand %p1855_p4, %p2527_p13  ;;  %p1861_p0 = por %p1860_p12, %p1859_p11 }
  0xa9   : > { %p1857_p10 = pneg %p1856_p5  ;;  %p1863_p3 = por %p1862_p1, %p1861_p0 }
  0xab   : > { %p1864_p7 = pnand %p1863_p3, %p1857_p10 }
  0xad   : > { %1867 = shalt.err (!%p1864_p7)
}
  0xae   : > { %s1868_s10 = scalar_lea.vmem %s2284_s21, 16  ;;  %s2002_s20 = smov [#allocation5]  }
  0xaf   : > { %p1869_p6 = scmp.ne.s32.totalorder %s2284_s21, %s1868_s10  ;;  %s1872_s25 = sshll.u32 %s2002_s20, 4  ;;  %s1873_s25 = int_to_ptr.vmem [resolvable:$false] %s1872_s25 }
  0xb0   : > { %s1874_s29 = scalar_lea.vmem %s1873_s25, 32  ;;  %p1875_p2 = scmp.lt.s32.totalorder %s2284_s21, %s1873_s25 }
  0xb1   : > { %p1870_p8 = pnand %p1869_p6, %p2527_p13  ;;  %p1876_p4 = scmp.lt.s32.totalorder %s1874_s29, %s1868_s10 }
  0xb3   : > { %p1871_p9 = pneg %p1870_p8  ;;  %p1877_p5 = por %p1876_p4, %p1875_p2 }
  0xb5   : > { %p1878_p11 = pnand %p1877_p5, %p1871_p9 }
  0xb7   : > { %1881 = shalt.err (!%p1878_p11)
}
  0xb8   : > { %1594 = dma.hbm_to_vmem [thread:$0]  (%p2527_p13), %s430_s7, 16, %s2284_s21, %s421_s26  }
  0xb9 PF: > { %p2528_p10 = scmp.ne.s32.totalorder %s2523_s11, 0 }
  0xba   : > { %s2308_s16 = sand.u32 (!%p2528_p10), 1, %s1968_s18   ;;  %p2529_p12 = scmp.ne.s32.totalorder (!%p2528_p10), %s2517_s13, 0 }
  0xbb   : > { %441 = sbr.rel (%p2528_p10) target bundleno = 952 (0x3b8), region = 64  ;;  %s1373_s27 = sshll.u32 (!%p2528_p10), %s2308_s16, 3 }
  0xbc   : > { %s444_s28 = scalar_lea.sflag (!%p2528_p10), [#allocation3], %s2308_s16  ;;  %s2314_s5 = scalar_lea.vmem (!%p2528_p10), [#allocation2], %s1373_s27 }
  0xc2   : > { %1943 = dma.done.wait (%p2529_p12), %s444_s28, 128  }
  0xc3   : > { %1945 = vsyncadd (%p2529_p12), %s444_s28, 4294967168  ;;  %s2530_s12 = sld [smem:[#allocation20_spill]]  ;;  %s455_s6 = scalar_lea.vmem [#allocation5], %s2308_s16 }
  0xc9   : > { %s452_s11 = sand.u32 1, %s2530_s12  }
  0xca   : > { %s453_s21 = scalar_lea.sflag [#allocation6], %s452_s11 }
  0xcb   : > { %1947 = dma.done.wait (%p2529_p12), %s453_s21, 16  }
  0xcc   : > { %1949 = vsyncadd (%p2529_p12), %s453_s21, 4294967280  ;;  %p2531_p13 = scmp.eq.s32.totalorder %s2530_s12, 0 }
  0xce   : > { %1951 = dma.done.wait (%p2531_p13), [#allocation6], 1024   ;;  %p2532_p0 = pmov %p2531_p13 }
  0xd0   : > { %1953 = vsyncadd (%p2532_p0), [#allocation6], 4294966272  ;;  %p2533_p1 = pmov %p2532_p0 }
  0xd1   : > { %p2534_p3 = pmov %p2532_p0 }
  0xd2   : > { %1955 = dma.done.wait (%p2533_p1), [#allocation9], 4096  }
  0xd3   : > { %1957 = vsyncadd (%p2534_p3), [#allocation9], 4294963200  ;;  %v2003_v0 = vmov 0.0   ;;  %vm2004_vm0 = vmmov 0   ;;  %v1700_v1 = vld [vmem:[#allocation7] sm:$0xff]   ;;  %v1701_v2 = vld [vmem:[#allocation7 + $0x8] sm:$0xff]   ;;  %v699_v35 = vlaneseq }
  0xd4   : > { %1505 = vmatprep.subr.bf16.mxu0 %v2003_v0  ;;  %1525 = vmatprep.subr.bf16.mxu1 %v2003_v0  ;;  %v1702_v3 = vld [vmem:[#allocation7 + $0x10] sm:$0xff]   ;;  %v1703_v4 = vld [vmem:[#allocation7 + $0x18] sm:$0xff]   ;;  %v1704_v5 = vld [vmem:[#allocation7 + $0x20] sm:$0xff]   ;;  %s2535_s13 = sld [smem:[#allocation18_spill]]  ;;  %s2536_s15 = sld [smem:[#allocation26_spill]] }
  0xd5   : > { %1521 = vmatprep.mubr.msk.bf16.mxu0 %vm2004_vm0, %v2003_v0  ;;  %1541 = vmatprep.mubr.msk.bf16.mxu1 %vm2004_vm0, %v2003_v0  ;;  %v1705_v6 = vld [vmem:[#allocation7 + $0x28] sm:$0xff]   ;;  %v1706_v7 = vld [vmem:[#allocation7 + $0x30] sm:$0xff]   ;;  %v1707_v8 = vld [vmem:[#allocation7 + $0x38] sm:$0xff]   ;;  %v700_v36 = vshrl.u32 %v699_v35, 7  ;;  %s2537_s20 = sld [smem:[#allocation27_spill]]  ;;  %s2538_s28 = sld [smem:[#allocation28_spill]] }
  0xd6   : > { %1506 = vmatpush3.bf16.msra.mxu0 %v1700_v1  ;;  %1526 = vmatpush3.bf16.msra.mxu1 %v1700_v1  ;;  %v2353_v9 = vld [vmem:[%s2314_s5] sm:$0xff]   ;;  %v1709_v10 = vld [vmem:[#allocation8 + $0x40] sm:$0xff]   ;;  %s2539_s11 = sld [smem:[#allocation29_spill]]  ;;  %s1196_s14 = scalar_lea.sflag [#allocation4], %s2308_s16 }
  0xd7   : > { %1507 = vmatprep.subr.bf16.mxu0 %v2003_v0  ;;  %1527 = vmatprep.subr.bf16.mxu1 %v2003_v0  ;;  %v524_v11 = vld [vmem:[%s455_s6] sm:$0x1]  ;;  %v1710_v12 = vld [vmem:[#allocation8] sm:$0xff]   ;;  %v1715_v17 = vld [vmem:[#allocation8 + $0x50] sm:$0xff]   ;;  %v701_v37 = vadd.s32 8, %v700_v36  ;;  %v739_v58 = vsub.s32 0, %v700_v36 }
  0xd8   : > { %v1711_v13 = vld [vmem:[#allocation8 + $0x80] sm:$0xff]   ;;  %v1712_v14 = vld [vmem:[#allocation8 + $0x48] sm:$0xff]   ;;  %v1716_v18 = vld [vmem:[#allocation8 + $0x10] sm:$0xff]   ;;  %v754_v59 = vsub.s32 1, %v700_v36  ;;  %vm724_vm7 = vcmp.eq.s32.totalorder %v700_v36, 0  ;;  %vm730_vm8 = vcmp.lt.s32.totalorder %v700_v36, 1 }
  0xd9   : > { %v1713_v15 = vld [vmem:[#allocation8 + $0x8] sm:$0xff]   ;;  %v1717_v19 = vld [vmem:[#allocation8 + $0x90] sm:$0xff]   ;;  %v1718_v20 = vld [vmem:[#allocation8 + $0x58] sm:$0xff]   ;;  %vm727_vm5 = vcmp.eq.s32.totalorder %v701_v37, 15  ;;  %vm745_vm9 = vcmp.lt.s32.totalorder %v700_v36, 7  ;;  %s2542_s17 = sld [smem:[#allocation23_spill]] }
  0xda   : > { %1508 = vmatpush3.bf16.msra.mxu0 %v1701_v2  ;;  %1528 = vmatpush3.bf16.msra.mxu1 %v1701_v2  ;;  %v1714_v16 = vld [vmem:[#allocation8 + $0x88] sm:$0xff]   ;;  %v1719_v21 = vld [vmem:[#allocation8 + $0x18] sm:$0xff]   ;;  %v1721_v23 = vld [vmem:[#allocation8 + $0x60] sm:$0xff]   ;;  %s1378_s7 = sshll.u32 %s2535_s13, 4  ;;  %p713_p7 = scmp.gt.s32.totalorder %s2535_s13, 0 }
  0xdb   : > { %1509 = vmatprep.subr.bf16.mxu0 %v2003_v0  ;;  %1529 = vmatprep.subr.bf16.mxu1 %v2003_v0  ;;  %v1720_v22 = vld [vmem:[#allocation8 + $0x98] sm:$0xff]   ;;  %v1722_v24 = vld [vmem:[#allocation8 + $0x20] sm:$0xff]   ;;  %v1724_v26 = vld [vmem:[#allocation8 + $0x68] sm:$0xff]   ;;  %s714_s26 = sadd.s32 16, %s1378_s7  ;;  %v702_v38 = vstv %s1378_s7  ;;  %s2540_s13 = sld [smem:[#allocation30_spill]] }
  0xdc   : > { %v1723_v25 = vld [vmem:[#allocation8 + $0xa0] sm:$0xff]   ;;  %v1725_v27 = vld [vmem:[#allocation8 + $0x28] sm:$0xff]   ;;  %v1727_v29 = vld [vmem:[#allocation8 + $0x70] sm:$0xff]   ;;  %p715_p6 = scmp.lt.s32.totalorder %s714_s26, 40  ;;  %v703_v40 = vadd.s32 %v702_v38, %v700_v36  ;;  %v704_v44 = vadd.s32 %v702_v38, %v701_v37 }
  0xdd   : > { %v1726_v28 = vld [vmem:[#allocation8 + $0xa8] sm:$0xff]   ;;  %v1728_v30 = vld [vmem:[#allocation8 + $0x30] sm:$0xff]   ;;  %v1730_v32 = vld [vmem:[#allocation8 + $0x78] sm:$0xff]   ;;  %s716_s8 = scalar_select %p713_p7, 1, 0 }
  0xde   : > { %1510 = vmatpush3.bf16.msra.mxu0 %v1702_v3  ;;  %1530 = vmatpush3.bf16.msra.mxu1 %v1702_v3  ;;  %v1729_v31 = vld [vmem:[#allocation8 + $0xb0] sm:$0xff]   ;;  %v1731_v33 = vld [vmem:[#allocation8 + $0x38] sm:$0xff]   ;;  %s720_s30 = scalar_select %p715_p6, 1, 0  ;;  %v1388_v39 = vld [vmem:[%s2536_s15] ss:$0 sm:$0xff] }
  0xdf   : > { %1511 = vmatprep.subr.bf16.mxu0 %v2003_v0  ;;  %1531 = vmatprep.subr.bf16.mxu1 %v2003_v0  ;;  %v1732_v34 = vld [vmem:[#allocation8 + $0xb8] sm:$0xff]   ;;  %v1389_v41 = vld [vmem:[%s2537_s20] ss:$0 sm:$0xff]  ;;  %v717_v47 = vstv %s716_s8  ;;  %vm705_vm1 = vcmp.lt.s32.totalorder %v703_v40, 40  ;;  %vm706_vm4 = vcmp.lt.s32.totalorder %v704_v44, 40  ;;  %s2541_s8 = sld [smem:[#allocation31_spill]] }
  0xe0   : > { %v721_v48 = vstv %s720_s30  ;;  %vm718_vm2 = vcmp.eq.s32.totalorder %v717_v47, 1  ;;  %vm1414_vm6 = vmpackc.low %vm706_vm4, %vm705_vm1  ;;  %v1417_v36 = vld [vmem:[%s2538_s28] ss:$0 sm:$0xff]  ;;  %s509_s30 = scalar_lea.vmem [#allocation11], %s1373_s27  ;;  %p2543_p8 = scmp.ne.s32.totalorder %s2542_s17, 0 }
  0xe1   : > { %vm722_vm3 = vcmp.eq.s32.totalorder %v721_v48, 1  ;;  %s2544_s15 = sld [smem:[#allocation18_spill]] (%p2543_p8) }
  0xe2   : > { %1512 = vmatpush3.bf16.msra.mxu0 %v1703_v4  ;;  %1532 = vmatpush3.bf16.msra.mxu1 %v1703_v4 }
  0xe3   : > { %1513 = vmatprep.subr.bf16.mxu0 %v2003_v0  ;;  %1533 = vmatprep.subr.bf16.mxu1 %v2003_v0 }
  0xe6   : > { %1514 = vmatpush3.bf16.msra.mxu0 %v1704_v5  ;;  %1534 = vmatpush3.bf16.msra.mxu1 %v1704_v5 }
  0xe7   : > { %1515 = vmatprep.subr.bf16.mxu0 %v2003_v0  ;;  %1535 = vmatprep.subr.bf16.mxu1 %v2003_v0  ;;  %s1432_s9 = sshll.u32 (%p2543_p8), %s2544_s15, 1 }
  0xe8   : > { %s1204_s10 = ssub.s32 (%p2543_p8), 5, %s1432_s9 }
  0xe9   : > { %p1205_p9 = scmp.lt.s32.totalorder (%p2543_p8), %s1204_s10, 2 }
  0xea   : > { %1516 = vmatpush3.bf16.msra.mxu0 %v1705_v6  ;;  %1536 = vmatpush3.bf16.msra.mxu1 %v1705_v6 }
  0xeb   : > { %1517 = vmatprep.subr.bf16.mxu0 %v2003_v0  ;;  %1537 = vmatprep.subr.bf16.mxu1 %v2003_v0 }
  0xee   : > { %1518 = vmatpush3.bf16.msra.mxu0 %v1706_v7  ;;  %1538 = vmatpush3.bf16.msra.mxu1 %v1706_v7 }
  0xef   : > { %1519 = vmatprep.subr.bf16.mxu0 %v2003_v0  ;;  %1539 = vmatprep.subr.bf16.mxu1 %v2003_v0 }
  0xf2   : > { %1520 = vmatpush3.bf16.msra.mxu0 %v1707_v8  ;;  %1540 = vmatpush3.bf16.msra.mxu1 %v1707_v8 }
  0xf3   : > { %1465 = vmatprep.subr.bf16.mxu0 %v1709_v10  ;;  %1545 = vmatprep.subr.bf16.mxu1 %v2003_v0 }
  0xf5   : > { %1522 = vmatmul.mubr.bf16.vlgmr.msra.gmra.mrb[0].mxu0 %v2353_v9  ;;  %1542 = vmatmul.mubr.bf16.vlgmr.msra.gmra.mrb[0].mxu1 %v524_v11 }
  0xf6   : > { %1466 = vmatpush3.bf16.msra.mxu0 %v1710_v12  ;;  %1546 = vmatpush3.bf16.msra.mxu1 %v1711_v13 }
  0xf7   : > { %1467 = vmatprep.subr.bf16.mxu0 %v1712_v14  ;;  %1547 = vmatprep.subr.bf16.mxu1 %v2003_v0 }
  0xf8   : > { %1561 = vmatprep.mubr.msk.bf16.mxu1 %vm2004_vm0, %v2003_v0 }
  0xfa   : > { %1468 = vmatpush3.bf16.msra.mxu0 %v1713_v15  ;;  %1548 = vmatpush3.bf16.msra.mxu1 %v1714_v16 }
  0xfb   : > { %1469 = vmatprep.subr.bf16.mxu0 %v1715_v17  ;;  %1549 = vmatprep.subr.bf16.mxu1 %v2003_v0 }
  0xfe   : > { %1470 = vmatpush3.bf16.msra.mxu0 %v1716_v18  ;;  %1550 = vmatpush3.bf16.msra.mxu1 %v1717_v19  ;;  %v1733_v19 = vld [vmem:[#allocation10] sm:$0xff]  }
  0xff   : > { %1471 = vmatprep.subr.bf16.mxu0 %v1718_v20  ;;  %1551 = vmatprep.subr.bf16.mxu1 %v2003_v0 }
 0x102   : > { %1472 = vmatpush3.bf16.msra.mxu0 %v1719_v21  ;;  %1552 = vmatpush3.bf16.msra.mxu1 %v1720_v22  ;;  %v1734_v22 = vld [vmem:[#allocation10 + $0x8] sm:$0xff]  }
 0x103   : > { %1553 = vmatprep.subr.bf16.mxu1 %v2003_v0  ;;  %1473 = vmatprep.subr.bf16.mxu0 %v1721_v23  ;;  %v1735_v23 = vld [vmem:[#allocation10 + $0x10] sm:$0xff]  }
 0x106   : > { %1474 = vmatpush3.bf16.msra.mxu0 %v1722_v24  ;;  %1554 = vmatpush3.bf16.msra.mxu1 %v1723_v25  ;;  %v1736_v24 = vld [vmem:[#allocation10 + $0x18] sm:$0xff]   ;;  %v1737_v25 = vld [vmem:[#allocation10 + $0x20] sm:$0xff]  }
 0x107   : > { %1555 = vmatprep.subr.bf16.mxu1 %v2003_v0  ;;  %1475 = vmatprep.subr.bf16.mxu0 %v1724_v26  ;;  %v1738_v26 = vld [vmem:[#allocation10 + $0x28] sm:$0xff]  }
 0x10a   : > { %1476 = vmatpush3.bf16.msra.mxu0 %v1725_v27  ;;  %1556 = vmatpush3.bf16.msra.mxu1 %v1726_v28  ;;  %v1739_v27 = vld [vmem:[#allocation10 + $0x30] sm:$0xff]   ;;  %v1740_v28 = vld [vmem:[#allocation10 + $0x38] sm:$0xff]  }
 0x10b   : > { %1557 = vmatprep.subr.bf16.mxu1 %v2003_v0  ;;  %1477 = vmatprep.subr.bf16.mxu0 %v1727_v29 }
 0x10e   : > { %1478 = vmatpush3.bf16.msra.mxu0 %v1728_v30  ;;  %1558 = vmatpush3.bf16.msra.mxu1 %v1729_v31 }
 0x10f   : > { %1559 = vmatprep.subr.bf16.mxu1 %v2003_v0  ;;  %1479 = vmatprep.subr.bf16.mxu0 %v1730_v32 }
 0x112   : > { %1480 = vmatpush3.bf16.msra.mxu0 %v1731_v33  ;;  %1560 = vmatpush3.bf16.msra.mxu1 %v1732_v34 }
 0x113   : > { %1565 = vmatprep.subr.bf16.mxu0 %v2003_v0 }
 0x1c8   : > { %v631_v42 = vpop.f32.mrb[0].mxu0  ;;  %v690_v43 = vpop.f32.mrb[0].mxu1 }
 0x1c9   : > { %v644_v45 = vmul.f32 %v1388_v39, %v631_v42  ;;  %v696_v46 = vmul.f32 %v1388_v39, %v690_v43  ;;  %v1523_v49 = vpop.f32.mrb[1].mxu0  ;;  %v1543_v50 = vpop.f32.mrb[1].mxu1 }
 0x1ca   : > { %v634_v51 = vpop.f32.mrb[2].mxu0  ;;  %v693_v52 = vpop.f32.mrb[2].mxu1  ;;  %v1427_v49 = vld [vmem:[%s2540_s13] ss:$0 sm:$0xff] }
 0x1cb   : > { %v652_v53 = vadd.f32 %v1389_v41, %v644_v45  ;;  %v697_v54 = vadd.f32 %v1389_v41, %v696_v46  ;;  %v645_v55 = vmul.f32 %v1388_v39, %v634_v51  ;;  %v1524_v56 = vpop.f32.mrb[3].mxu0  ;;  %v1544_v57 = vpop.f32.mrb[3].mxu1  ;;  %v1428_v51 = vld [vmem:[%s2541_s8] ss:$0 sm:$0xff]  ;;  %v1179_v52 = vunpack.c.l.bf16 %v2353_v9 }
 0x1cc   : > { %v1180_v56 = vunpack.c.h.bf16 %v2353_v9 }
 0x1cd   : > { %v654_v60 = vmax.f32 %v652_v53, 0.0  ;;  %v698_v61 = vmax.f32 %v697_v54, 0.0  ;;  %v653_v62 = vadd.f32 %v1389_v41, %v645_v55 }
 0x1cf   : > { %v719_v63 = vsel %vm718_vm2, %v698_v61, 0.0  ;;  %v723_v1 = vsel %vm722_vm3, %v698_v61, 0.0  ;;  %v655_v2 = vmax.f32 %v653_v62, 0.0  ;;  %v711_v3 = vsel %vm705_vm1, %v654_v60, 0.0 }
 0x1d0   : > { %v740_v4 = vrot.slane %v719_v63, %v739_v58  ;;  %v755_v5 = vrot.slane %v723_v1, %v754_v59  ;;  %v728_v8 = vrot.slane %v711_v3, 7  ;;  %v743_v11 = vrot.slane %v711_v3, 1 }
 0x1d1   : > { %v1415_v6 = vpack.c.bf16 %v655_v2, %v654_v60  ;;  %v712_v7 = vsel %vm706_vm4, %v655_v2, 0.0 }
 0x1d2   : > { %v729_v10 = vrot.slane %v712_v7, 7  ;;  %v744_v12 = vrot.slane %v712_v7, 1 }
 0x1d3   : > { %1416 = vmatprep.mubr.msk.bf16.mxu0 %vm1414_vm6, %v1415_v6 }
 0x1d4   : > { %v731_v13 = vsel %vm730_vm8, %v728_v8, %v729_v10  ;;  %v732_v14 = vsel %vm730_vm8, %v729_v10, %v728_v8  ;;  %v746_v15 = vsel %vm745_vm9, %v743_v11, %v744_v12  ;;  %v747_v16 = vsel %vm745_vm9, %v744_v12, %v743_v11 }
 0x1d5   : > { %v741_v17 = vsel %vm724_vm7, %v740_v4, %v732_v14  ;;  %v757_v18 = vsel %vm727_vm5, %v755_v5, %v747_v16 }
 0x1d6   : > { %v758_v20 = vpack.c.bf16 %v731_v13, %v741_v17  ;;  %v760_v21 = vpack.c.bf16 %v757_v18, %v746_v15 }
 0x1d8   : > { %986 = vmatmul.mubr.bf16.vlgmr.msra.gmra.mrb[4].mxu0 %v758_v20  ;;  %1562 = vmatmul.mubr.bf16.vlgmr.msra.gmra.mrb[4].mxu1 %v760_v21 }
 0x1d9   : > { %1566 = vmatpush3.bf16.msra.mxu0 %v1733_v19  ;;  %1581 = vmatprep.mubr.msk.bf16.mxu0 %vm2004_vm0, %v2003_v0 }
 0x1da   : > { %1567 = vmatprep.subr.bf16.mxu0 %v2003_v0 }
 0x1dd   : > { %1568 = vmatpush3.bf16.msra.mxu0 %v1734_v22 }
 0x1de   : > { %1569 = vmatprep.subr.bf16.mxu0 %v2003_v0 }
 0x1e1   : > { %1570 = vmatpush3.bf16.msra.mxu0 %v1735_v23 }
 0x1e2   : > { %1571 = vmatprep.subr.bf16.mxu0 %v2003_v0 }
 0x1e5   : > { %1572 = vmatpush3.bf16.msra.mxu0 %v1736_v24 }
 0x1e6   : > { %1573 = vmatprep.subr.bf16.mxu0 %v2003_v0 }
 0x1e9   : > { %1574 = vmatpush3.bf16.msra.mxu0 %v1737_v25 }
 0x1ea   : > { %1575 = vmatprep.subr.bf16.mxu0 %v2003_v0 }
 0x1ed   : > { %1576 = vmatpush3.bf16.msra.mxu0 %v1738_v26 }
 0x1ee   : > { %1577 = vmatprep.subr.bf16.mxu0 %v2003_v0 }
 0x1f1   : > { %1578 = vmatpush3.bf16.msra.mxu0 %v1739_v27 }
 0x1f2   : > { %1579 = vmatprep.subr.bf16.mxu0 %v2003_v0  ;;  %v1418_v0 = vld [vmem:[%s2539_s11] ss:$0 sm:$0xff] }
 0x1f5   : > { %1580 = vmatpush3.bf16.msra.mxu0 %v1740_v28 }
 0x2ab   : > { %v1481_v29 = vpop.f32.mrb[4].mxu0  ;;  %v1028_v30 = vpop.f32.mrb[4].mxu1 }
 0x2ac   : > { %v1482_v31 = vpop.f32.mrb[5].mxu0  ;;  %v1563_v32 = vpop.f32.mrb[5].mxu1 }
 0x2ad   : > { %v1483_v33 = vadd.f32 %v1482_v31, %v1481_v29  ;;  %v1484_v34 = vpop.f32.mrb[6].mxu0  ;;  %v1031_v35 = vpop.f32.mrb[6].mxu1 }
 0x2ae   : > { %v1485_v37 = vpop.f32.mrb[7].mxu0  ;;  %v1564_v38 = vpop.f32.mrb[7].mxu1 }
 0x2af   : > { %v1029_v39 = vadd.f32 %v1483_v33, %v1028_v30  ;;  %v1486_v40 = vadd.f32 %v1485_v37, %v1484_v34 }
 0x2b1   : > { %v1042_v41 = vmul.f32 %v1417_v36, %v1029_v39  ;;  %v1032_v42 = vadd.f32 %v1486_v40, %v1031_v35 }
 0x2b3   : > { %v1051_v43 = vadd.f32 %v1418_v0, %v1042_v41  ;;  %v1043_v44 = vmul.f32 %v1417_v36, %v1032_v42 }
 0x2b5   : > { %v1052_v45 = vadd.f32 %v1418_v0, %v1043_v44  ;;  %v1053_v46 = vmax.f32 %v1051_v43, 0.0 }
 0x2b7   : > { %v1054_v47 = vmax.f32 %v1052_v45, 0.0 }
 0x2b9   : > { %v1055_v48 = vpack.c.bf16 %v1054_v47, %v1053_v46 }
 0x2bb   : > { %1582 = vmatmul.mubr.bf16.vlgmr.msra.gmra.mrb[8].mxu0 %v1055_v48 }
 0x38e   : > { %v1154_v50 = vpop.f32.mrb[8].mxu0 }
 0x38f   : > { %v1168_v53 = vmul.f32 %v1427_v49, %v1154_v50  ;;  %v1583_v54 = vpop.f32.mrb[9].mxu0 }
 0x390   : > { %v1157_v55 = vpop.f32.mrb[10].mxu0 }
 0x391   : > { %v1177_v57 = vadd.f32 %v1428_v51, %v1168_v53  ;;  %v1169_v58 = vmul.f32 %v1427_v49, %v1157_v55  ;;  %v1584_v59 = vpop.f32.mrb[11].mxu0 }
 0x393   : > { %v1181_v60 = vadd.f32 %v1179_v52, %v1177_v57  ;;  %v1178_v61 = vadd.f32 %v1428_v51, %v1169_v58 }
 0x395   : > { %v1182_v62 = vadd.f32 %v1180_v56, %v1178_v61  ;;  %v1183_v63 = vmax.f32 %v1181_v60, 0.0  ;;  %1202 = sbr.rel (!%p2543_p8) target bundleno = 952 (0x3b8), region = 88 }
 0x397   : > { %v1184_v1 = vmax.f32 %v1182_v62, 0.0 }
 0x399   : > { %v1445_v2 = vpack.c.bf16 %v1184_v1, %v1183_v63 }
 0x39b   : > { %1446 = vst [vmem:[%s509_s30] sm:$0xff] %v1445_v2  }
 0x39c   : > { %s2569_s10 = smov (!%p1205_p9, %s1204_s10), 2 }
 0x39d   : > { %s2410_s20 = sshll.u32 %s2569_s10, 6 }
 0x39e   : > { %s1209_s25 = ssub.s32 128, %s2410_s20 }
 0x39f   : > { %1210 = vsyncadd %s1196_s14, %s1209_s25  ;;  %s2545_s29 = sld [smem:[#allocation19_spill]]  ;;  %p1434_p2 = scmp.ne.s32.totalorder %s2410_s20, 0 }
 0x3a0   : > { %s1217_s28 = sshll.u32 %s509_s30, 4  ;;  %s2546_s6 = sld [smem:[#allocation32_spill]]  ;;  %s2417_s28 = int_to_ptr.vmem [resolvable:$true] %s1217_s28 }
 0x3a1   : > { %s1882_s7 = scalar_lea.vmem %s2417_s28, %s2410_s20  ;;  %s2005_s26 = smov [#allocation11]  }
 0x3a2   : > { %p1883_p4 = scmp.ne.s32.totalorder %s2417_s28, %s1882_s7  ;;  %s1886_s8 = sshll.u32 %s2005_s26, 4  ;;  %s1887_s8 = int_to_ptr.vmem [resolvable:$false] %s1886_s8 }
 0x3a3   : > { %s1888_s30 = scalar_lea.vmem %s1887_s8, 256  ;;  %p1889_p10 = scmp.lt.s32.totalorder %s2417_s28, %s1887_s8 }
 0x3a4   : > { %p1884_p5 = pnand %p1883_p4, %p1434_p2  ;;  %p1890_p12 = scmp.lt.s32.totalorder %s1888_s30, %s1882_s7 }
 0x3a5   : > { %s1587_s27 = smul.u32 5, %s2545_s29 }
 0x3a6   : > { %p1885_p11 = pneg %p1884_p5  ;;  %p1891_p13 = por %p1890_p12, %p1889_p10 }
 0x3a7   : > { %s1213_s5 = sadd.s32 %s1587_s27, %s1432_s9 }
 0x3a8   : > { %s1435_s12 = sshll.u32 %s1213_s5, 6  ;;  %p1892_p0 = pnand %p1891_p13, %p1885_p11 }
 0x3a9   : > { %s2422_s13 = scalar_lea.hbm %s2546_s6, %s1435_s12 }
 0x3aa   : > { %1895 = shalt.err (!%p1892_p0)
}
 0x3ab   : > { %s1896_s17 = scalar_lea.hbm %s2422_s13, %s2410_s20  ;;  %s1900_s10 = scalar_lea.hbm %s2546_s6, 640 }
 0x3ac   : > { %p1897_p1 = scmp.ne.s32.totalorder %s2422_s13, %s1896_s17  ;;  %p1901_p6 = scmp.lt.u32.totalorder %s2422_s13, %s2546_s6 }
 0x3ad   : > { %p1902_p8 = scmp.lt.u32.totalorder %s1900_s10, %s1896_s17  ;;  %p1904_p4 = scmp.lt.u32.totalorder %s1896_s17, %s2422_s13 }
 0x3ae   : > { %p1898_p3 = pnand %p1897_p1, %p1434_p2 }
 0x3af   : > { %p1903_p9 = por %p1902_p8, %p1901_p6 }
 0x3b0   : > { %p1899_p7 = pneg %p1898_p3 }
 0x3b1   : > { %p1905_p5 = por %p1904_p4, %p1903_p9 }
 0x3b3   : > { %p1906_p11 = pnand %p1905_p5, %p1899_p7 }
 0x3b5   : > { %1909 = shalt.err (!%p1906_p11)
}
 0x3b6   : > { %s2006_s27 = smov 64   ;;  %s2007_s5 = smov 4  }
 0x3b7   : > { %1223 = dma.vmem_to_hbm [thread:$0]  (%p1434_p2), %s2417_s28, %s2410_s20, %s2422_s13, %s1196_s14, %s2006_s27, %s2006_s27, %s2007_s5  }
 0x3b8 PF: > { %s2547_s12 = sld [smem:[#allocation17_spill]]  ;;  %s2548_s11 = sld [smem:[#allocation24_spill]] }
 0x3b9   : > { %p1624_p10 = scmp.ge.s32.totalorder %s1992_s24, 2 }
 0x3be   : > { %s1232_s21 = sand.u32 1, %s2547_s12   ;;  %p2549_p12 = scmp.ne.s32.totalorder %s2548_s11, 0 }
 0x3bf   : > { %s1233_s7 = scalar_lea.sflag [#allocation4], %s1232_s21 }
 0x3c0   : > { %p1615_p13 = pnand %p1624_p10, %p2549_p12 }
 0x3c2   : > { %1959 = dma.done.wait (!%p1615_p13), %s1233_s7, 128  }
 0x3c3   : > { %1961 = vsyncadd (!%p1615_p13), %s1233_s7, 4294967168  ;;  %s31_s24 = sadd.s32 1, %s1992_s24   ;;  %s2550_s26 = sld [smem:[#allocation25_spill]] }
 0x3c4   : > { %p28_p0 = scmp.ge.s32.totalorder %s31_s24, 8   ;;  %s2551_s16 = sld [smem:[#allocation21_spill]] }
 0x3c5   : > { %s2552_s14 = sld [smem:[#allocation22_spill]]  ;;  %s2553_s17 = smov %s1968_s18 }
 0x3c6   : > { %s2554_s18 = smov %s1972_s19  ;;  %s2556_s20 = smov %s1984_s22 }
 0x3c7   : > { %s2557_s21 = smov %s1988_s23  ;;  %30 = sbr.rel (!%p28_p0) target bundleno = 18 (0x12), region = 134 }
 0x3c9   : > { %s2555_s19 = smov %s2550_s26 }
 0x3ca   : > { %s2558_s22 = smov %s2551_s16 }
 0x3cb   : > { %s2559_s23 = smov %s2552_s14 }
 0x3ce   :  { %1238 = vsyncpa [#allocation3], 1 }
 0x3cf   :  { %1240 = vsyncpa [#allocation3 + $0x1], 1 }
 0x3d0   :  { %1241 = vsyncpa [#allocation6], 1 }
 0x3d1   :  { %1243 = vsyncpa [#allocation6 + $0x1], 1 }
 0x3d2   :  { %1244 = vsyncpa [#allocation9], 1 }
 0x3d3   :  { %1245 = vsyncpa [#allocation4], 1 }
 0x3d4   :  { %1247 = vsyncpa [#allocation4 + $0x1], 1 }

</bundles_post_ra>
